<compile_context>
chip_gen: v5e
topology: v5e:2x2
jax: 0.10.0
libtpu: 0.0.40
codegen_flags: <defaults>
</compile_context>

<pallas_src>
import functools

import jax
import jax.numpy as jnp
from jax import lax
from jax.experimental import pallas as pl
from jax.experimental.pallas import tpu as pltpu


def _round_up(n, m):
    return ((n + m - 1) // m) * m


def _self_attention_kernel(xq_ref, xkv_ref, w_ref, o_ref, *, dk_pad, compute_dtype):
    w = w_ref[...]
    w_q = w[:, :dk_pad]            # 128-lane-aligned slices: whole-vreg views
    w_kv = w[:, dk_pad:]

    # Q for this query tile.  The ones column appended to x plus the bias row
    # appended to w realise the bias add inside the matmul; the 1/sqrt(d_kq)
    # scale is folded into the Q weight columns / bias on the host.
    q = jnp.dot(xq_ref[...], w_q, preferred_element_type=jnp.float32)

    # K | V for the whole sequence from the resident x rows.  Recomputed per
    # query tile so the grid axis stays safe under "parallel" (megacore).
    # TODO(synk): for large S / d_in, cache K|V in VMEM scratch under an
    # "arbitrary" grid axis, or go flash-style (key-tiled, online softmax).
    kv = jnp.dot(xkv_ref[...], w_kv, preferred_element_type=jnp.float32)
    k = kv[:, :dk_pad]
    v = kv[:, dk_pad:]

    # scores = Q @ K^T: contract the last dims of both operands directly so
    # the MXU consumes K transposed (no XLU transpose pass); the zero-padded
    # lanes contribute nothing to the dot product.
    scores = lax.dot_general(
        q.astype(compute_dtype), k.astype(compute_dtype),
        dimension_numbers=(((1,), (1,)), ((), ())),
        preferred_element_type=jnp.float32)

    # Numerically stable softmax over the key axis, entirely in f32.  Exact
    # divide: pl.reciprocal(approx=True) is too coarse for 1e-4 parity.
    m = jnp.max(scores, axis=-1, keepdims=True)
    e = jnp.exp(scores - m)
    denom = jnp.sum(e, axis=-1, keepdims=True)
    attn = e * (1.0 / denom)

    # context = attn @ V: lane-dense (tq, dv_pad) store.
    o_ref[...] = jnp.dot(attn.astype(compute_dtype), v.astype(compute_dtype),
                         preferred_element_type=jnp.float32).astype(o_ref.dtype)


def self_attention(x, W_query, W_key, W_value, b_query, b_key, b_value,
                   *, compute_dtype=jnp.float32, q_tile=None):
    """Matches SelfAttention.forward for 2-D x of shape (S, d_in)."""
    S, d_in = x.shape
    d_out_kq = W_query.shape[1]
    d_out_v = W_value.shape[1]
    dk_pad = _round_up(d_out_kq, 128)
    dv_pad = _round_up(d_out_v, 128)
    w_total = 2 * dk_pad + dv_pad
    d_aug = d_in + 1
    scale = 1.0 / (d_out_kq ** 0.5)
    f32 = jnp.float32

    # ---- one-time parameter fusion (constant-folds under jit) -------------
    # w_fused = [[Wq*scale | Wk | Wv]    each section zero-padded to 128 lanes
    #            [bq*scale |  0 | bv]]   bias row (affine / ones-column trick)
    # b_key is dropped: it adds a per-query constant along the softmax (key)
    # axis and cancels exactly.  NOTE: relies on softmax over axis=-1 with no
    # masking; revisit if either changes.
    wq = jnp.pad(W_query.astype(f32) * scale, ((0, 0), (0, dk_pad - d_out_kq)))
    wk = jnp.pad(W_key.astype(f32), ((0, 0), (0, dk_pad - d_out_kq)))
    wv = jnp.pad(W_value.astype(f32), ((0, 0), (0, dv_pad - d_out_v)))
    bias_row = jnp.concatenate([
        jnp.pad(b_query.astype(f32) * scale, (0, dk_pad - d_out_kq)),
        jnp.zeros((dk_pad,), f32),
        jnp.pad(b_value.astype(f32), (0, dv_pad - d_out_v)),
    ]).reshape(1, w_total)
    w_fused = jnp.concatenate(
        [jnp.concatenate([wq, wk, wv], axis=1), bias_row], axis=0
    ).astype(compute_dtype)                                   # (d_in+1, w_total)

    # x with the appended ones column, pre-cast to the MXU operand dtype.
    x_kv = jnp.concatenate(
        [x.astype(f32), jnp.ones((S, 1), f32)], axis=1).astype(compute_dtype)

    # ---- query-row tiling --------------------------------------------------
    tq = 256 if q_tile is None else q_tile
    tq = min(_round_up(S, 8), _round_up(max(tq, 8), 8))
    s_pad = _round_up(S, tq)
    n_tiles = s_pad // tq
    x_q = jnp.pad(x_kv, ((0, s_pad - S), (0, 0)))   # pad rows -> dead output rows

    kernel = functools.partial(_self_attention_kernel,
                               dk_pad=dk_pad, compute_dtype=compute_dtype)

    cd_bytes = jnp.dtype(compute_dtype).itemsize
    vmem_est = (2 * tq * d_aug * cd_bytes              # x_q tile, double-buffered
                + S * d_aug * cd_bytes                 # resident K/V source rows
                + d_aug * w_total * cd_bytes           # resident fused weights
                + 2 * tq * dv_pad * 4                  # out tile, double-buffered
                + (tq * dk_pad + S * (dk_pad + dv_pad)
                   + 2 * tq * S + tq * dv_pad) * 4)    # f32 temporaries
    vmem_limit = None
    if vmem_est > 16 * 1024 * 1024:     # above the smallest (v5e) scoped default
        vmem_limit = int(min(64 * 1024 * 1024, 2 * vmem_est))

    cost = pl.CostEstimate(
        flops=int(2 * s_pad * d_aug * dk_pad
                  + 2 * n_tiles * S * d_aug * (dk_pad + dv_pad)
                  + 2 * s_pad * S * dk_pad
                  + 2 * s_pad * S * dv_pad),
        transcendentals=int(s_pad * S),
        bytes_accessed=int((x_q.size + x_kv.size + w_fused.size) * cd_bytes
                           + s_pad * dv_pad * 4))

    out = pl.pallas_call(
        kernel,
        out_shape=jax.ShapeDtypeStruct((s_pad, dv_pad), x.dtype),
        grid_spec=pltpu.PrefetchScalarGridSpec(
            num_scalar_prefetch=0,
            grid=(n_tiles,),
            in_specs=[
                pl.BlockSpec((tq, d_aug), lambda i: (i, 0)),        # query rows
                pl.BlockSpec((S, d_aug), lambda i: (0, 0)),         # resident K/V rows
                pl.BlockSpec((d_aug, w_total), lambda i: (0, 0)),   # resident weights
            ],
            out_specs=pl.BlockSpec((tq, dv_pad), lambda i: (i, 0)),
        ),
        compiler_params=pltpu.CompilerParams(
            dimension_semantics=("parallel",),
            vmem_limit_bytes=vmem_limit),
        cost_estimate=cost,
    )(x_q, x_kv, w_fused)

    # TODO(synk): at this module's tiny shapes the call is pure launch/DMA
    # overhead; batch many attention instances through one pallas_call (extra
    # leading grid axis / vmap) before chasing further in-kernel wins.
    return out[:S, :d_out_v]


def self_attention_ref(x, W_query, W_key, W_value, b_query, b_key, b_value,
                       compute_dtype=jnp.float32):
    """Pure-JAX reference.  f32: exact torch forward.  Lower precision: mimics
    the kernel's cast points (low-precision MXU operands, f32 accumulate and
    softmax) so the bf16 path can be checked with a meaningful tolerance."""
    d_out_kq = W_query.shape[1]
    f32 = jnp.float32
    if jnp.dtype(compute_dtype) == jnp.dtype(jnp.float32):
        q = x @ W_query + b_query
        k = x @ W_key + b_key
        v = x @ W_value + b_value
        s = (q @ k.T) / (d_out_kq ** 0.5)
        return jax.nn.softmax(s, axis=-1) @ v
    cd = compute_dtype
    scale = 1.0 / (d_out_kq ** 0.5)
    c = lambda a: a.astype(f32).astype(cd)
    dot = lambda a, b: jnp.dot(a, b, preferred_element_type=f32)
    q = dot(c(x), c(W_query * scale)) + c(b_query * scale).astype(f32)
    k = dot(c(x), c(W_key))                     # key bias cancels in the softmax
    v = dot(c(x), c(W_value)) + c(b_value).astype(f32)
    s = dot(q.astype(cd), k.astype(cd).T)
    attn = jax.nn.softmax(s, axis=-1)
    return dot(attn.astype(cd), v.astype(cd))


if __name__ == "__main__":
    key = jax.random.PRNGKey(0)
    keys = jax.random.split(key, 14)

    # Small 2-D "tokens x features" shapes consistent with the module.
    S, d_in, d_out_kq, d_out_v = 8, 32, 16, 16
    x = jax.random.normal(keys[0], (S, d_in), dtype=jnp.float32)
    Wq = jax.random.uniform(keys[1], (d_in, d_out_kq), dtype=jnp.float32)
    Wk = jax.random.uniform(keys[2], (d_in, d_out_kq), dtype=jnp.float32)
    Wv = jax.random.uniform(keys[3], (d_in, d_out_v), dtype=jnp.float32)
    bq = jax.random.uniform(keys[4], (d_out_kq,), dtype=jnp.float32)
    bk = jax.random.uniform(keys[5], (d_out_kq,), dtype=jnp.float32)
    bv = jax.random.uniform(keys[6], (d_out_v,), dtype=jnp.float32)

    fn = jax.jit(self_attention, static_argnames=("compute_dtype", "q_tile"))

    # 1) f32 path, single query tile: must match the torch forward to 1e-4.
    out = jax.block_until_ready(fn(x, Wq, Wk, Wv, bq, bk, bv))
    ref = self_attention_ref(x, Wq, Wk, Wv, bq, bk, bv)
    assert out.shape == (S, d_out_v)
    assert bool(jnp.allclose(out, ref, atol=1e-4, rtol=1e-4)), \
        "f32 mismatch vs reference"

    # 2) f32 path, multi-tile query grid (q_tile=8 -> 4 tiles) + non-128 dv.
    S2, d_v2 = 32, 20
    x2 = jax.random.normal(keys[7], (S2, d_in), dtype=jnp.float32)
    Wq2 = jax.random.uniform(keys[8], (d_in, d_out_kq), dtype=jnp.float32)
    Wk2 = jax.random.uniform(keys[9], (d_in, d_out_kq), dtype=jnp.float32)
    Wv2 = jax.random.uniform(keys[10], (d_in, d_v2), dtype=jnp.float32)
    bq2 = jax.random.uniform(keys[11], (d_out_kq,), dtype=jnp.float32)
    bk2 = jax.random.uniform(keys[12], (d_out_kq,), dtype=jnp.float32)
    bv2 = jax.random.uniform(keys[13], (d_v2,), dtype=jnp.float32)
    out2 = jax.block_until_ready(fn(x2, Wq2, Wk2, Wv2, bq2, bk2, bv2, q_tile=8))
    ref2 = self_attention_ref(x2, Wq2, Wk2, Wv2, bq2, bk2, bv2)
    assert out2.shape == (S2, d_v2)
    assert bool(jnp.allclose(out2, ref2, atol=1e-4, rtol=1e-4)), \
        "tiled f32 mismatch vs reference"

    # 3) bf16 MXU-operand fast path (v5e/v6e/v7x): checked against a pure-JAX
    #    reference with matching cast points (f32 accumulate / f32 softmax).
    out_bf16 = jax.block_until_ready(
        fn(x, Wq, Wk, Wv, bq, bk, bv, compute_dtype=jnp.bfloat16))
    ref_bf16 = self_attention_ref(x, Wq, Wk, Wv, bq, bk, bv,
                                  compute_dtype=jnp.bfloat16)
    assert out_bf16.shape == (S, d_out_v)
    assert bool(jnp.isfinite(out_bf16).all())
    assert bool(jnp.allclose(out_bf16, ref_bf16, atol=2e-2, rtol=2e-2)), \
        "bf16 mismatch vs cast-matched reference"

    print("KERNEL_OK")
</pallas_src>

<mosaic_0001>
module attributes {stable_mosaic.version = 11 : i64} {
  func.func @_self_attention_kernel(%arg0: i32, %arg1: memref<8x33xf32, #tpu.memory_space<vmem>>, %arg2: memref<8x33xf32, #tpu.memory_space<vmem>>, %arg3: memref<33x384xf32, #tpu.memory_space<vmem>>, %arg4: memref<8x128xf32, #tpu.memory_space<vmem>>) attributes {dimension_semantics = [#tpu.dimension_semantics<parallel>], iteration_bounds = array<i64: 1>, scalar_prefetch = 0 : i64, scratch_operands = 0 : i64, tpu.core_type = #tpu.core_type<tc>, window_params = [{transform_indices = @transform_0, window_bounds = array<i64: 8, 33>}, {pipeline_mode = #tpu.pipeline_mode<synchronous>, transform_indices = @transform_1, window_bounds = array<i64: 8, 33>}, {pipeline_mode = #tpu.pipeline_mode<synchronous>, transform_indices = @transform_2, window_bounds = array<i64: 33, 384>}, {transform_indices = @transform_3, window_bounds = array<i64: 8, 128>}]} {
    %c0 = arith.constant 0 : index
    %c0_0 = arith.constant 0 : index
    %0 = vector.load %arg3[%c0, %c0_0] : memref<33x384xf32, #tpu.memory_space<vmem>>, vector<33x384xf32>
    %1 = vector.extract_strided_slice %0 {offsets = [0, 0], sizes = [33, 128], strides = [1, 1]} : vector<33x384xf32> to vector<33x128xf32>
    %2 = vector.extract_strided_slice %0 {offsets = [0, 128], sizes = [33, 256], strides = [1, 1]} : vector<33x384xf32> to vector<33x256xf32>
    %c0_1 = arith.constant 0 : index
    %c0_2 = arith.constant 0 : index
    %3 = vector.load %arg1[%c0_1, %c0_2] : memref<8x33xf32, #tpu.memory_space<vmem>>, vector<8x33xf32>
    %cst = arith.constant dense<0.000000e+00> : vector<8x128xf32>
    %4 = tpu.matmul %3, %1, %cst {dimension_numbers = #tpu.dot_dimension_numbers<[1], [0], [0], [1], [0, 0, 1, 1], [], []>} : vector<8x33xf32>, vector<33x128xf32>, vector<8x128xf32> -> vector<8x128xf32>
    %c0_3 = arith.constant 0 : index
    %c0_4 = arith.constant 0 : index
    %5 = vector.load %arg2[%c0_3, %c0_4] : memref<8x33xf32, #tpu.memory_space<vmem>>, vector<8x33xf32>
    %cst_5 = arith.constant dense<0.000000e+00> : vector<8x256xf32>
    %6 = tpu.matmul %5, %2, %cst_5 {dimension_numbers = #tpu.dot_dimension_numbers<[1], [0], [0], [1], [0, 0, 1, 1], [], []>} : vector<8x33xf32>, vector<33x256xf32>, vector<8x256xf32> -> vector<8x256xf32>
    %7 = vector.extract_strided_slice %6 {offsets = [0, 0], sizes = [8, 128], strides = [1, 1]} : vector<8x256xf32> to vector<8x128xf32>
    %8 = vector.extract_strided_slice %6 {offsets = [0, 128], sizes = [8, 128], strides = [1, 1]} : vector<8x256xf32> to vector<8x128xf32>
    %cst_6 = arith.constant dense<0.000000e+00> : vector<8x8xf32>
    %9 = tpu.matmul %4, %7, %cst_6 {dimension_numbers = #tpu.dot_dimension_numbers<[1], [1], [0], [0], [0, 0, 1, 0], [], []>} : vector<8x128xf32>, vector<8x128xf32>, vector<8x8xf32> -> vector<8x8xf32>
    %cst_7 = arith.constant dense<0xFF800000> : vector<8xf32>
    %10 = vector.multi_reduction <maximumf>, %9, %cst_7 [1] : vector<8x8xf32> to vector<8xf32>
    %11 = vector.shape_cast %10 : vector<8xf32> to vector<8x1xf32>
    %12 = vector.broadcast %11 : vector<8x1xf32> to vector<8x8xf32>
    %13 = arith.subf %9, %12 : vector<8x8xf32>
    %14 = math.exp %13 : vector<8x8xf32>
    %cst_8 = arith.constant dense<0.000000e+00> : vector<8xf32>
    %15 = vector.multi_reduction <add>, %14, %cst_8 [1] : vector<8x8xf32> to vector<8xf32>
    %16 = vector.shape_cast %15 : vector<8xf32> to vector<8x1xf32>
    %cst_9 = arith.constant 1.000000e+00 : f32
    %17 = vector.broadcast %cst_9 : f32 to vector<8x1xf32>
    %18 = arith.divf %17, %16 : vector<8x1xf32>
    %19 = vector.broadcast %18 : vector<8x1xf32> to vector<8x8xf32>
    %20 = arith.mulf %14, %19 : vector<8x8xf32>
    %cst_10 = arith.constant dense<0.000000e+00> : vector<8x128xf32>
    %21 = tpu.matmul %20, %8, %cst_10 {dimension_numbers = #tpu.dot_dimension_numbers<[1], [0], [0], [1], [0, 0, 1, 1], [], []>} : vector<8x8xf32>, vector<8x128xf32>, vector<8x128xf32> -> vector<8x128xf32>
    %c0_11 = arith.constant 0 : index
    %c0_12 = arith.constant 0 : index
    %22 = vector.load %arg4[%c0_11, %c0_12] : memref<8x128xf32, #tpu.memory_space<vmem>>, vector<8x128xf32>
    tpu.vector_store %arg4[%c0_11, %c0_12], %21 {strides = array<i32>} : memref<8x128xf32, #tpu.memory_space<vmem>>, vector<8x128xf32>,
    return
  }
  func.func @transform_0(%arg0: i32) -> (i32, i32) {
    %c0_i32 = arith.constant 0 : i32
    %c0_i32_0 = arith.constant 0 : i32
    return %arg0, %c0_i32 : i32, i32
  }
  func.func @transform_1(%arg0: i32) -> (i32, i32) {
    %c0_i32 = arith.constant 0 : i32
    %c0_i32_0 = arith.constant 0 : i32
    %c0_i32_1 = arith.constant 0 : i32
    return %c0_i32, %c0_i32_0 : i32, i32
  }
  func.func @transform_2(%arg0: i32) -> (i32, i32) {
    %c0_i32 = arith.constant 0 : i32
    %c0_i32_0 = arith.constant 0 : i32
    %c0_i32_1 = arith.constant 0 : i32
    return %c0_i32, %c0_i32_0 : i32, i32
  }
  func.func @transform_3(%arg0: i32) -> (i32, i32) {
    %c0_i32 = arith.constant 0 : i32
    %c0_i32_0 = arith.constant 0 : i32
    return %arg0, %c0_i32 : i32, i32
  }
}

</mosaic_0001>

<bundles_post_ra>
// kernel: self_attention.1
= control target key start
LH: loop header
LB: loop body
LE: loop exit
PB: predicated region body
PF: predicated region fallthrough
CT: control target
= control target key end

     0   :  { %vm35_vm0 = vcmask 1040384   ;;  %s317_s0 = inlined_call_operand.vmem [shape: f32[8,33], index: 0, kind: input, shape index: {}, may-alias: {0,1}]   ;;  %s318_s1 = inlined_call_operand.vmem [shape: f32[8,33], index: 1, kind: input, shape index: {}, may-alias: {0,1}]   ;;  %s319_s2 = inlined_call_operand.vmem [shape: f32[33,384], index: 2, kind: input, shape index: {}]   ;;  %s320_s3 = inlined_call_operand.hbm [shape: f32[8,128], index: 3, kind: output, shape index: {}]  }
   0x1   :  { %v28_v0 = vld [vmem:[%s319_s2 + $0x68] sm:$0x1]  ;;  %v25_v1 = vld [vmem:[%s319_s2 + $0x50] sm:$0xff]  ;;  %v27_v2 = vld [vmem:[%s319_s2 + $0x60] sm:$0x1] }
   0x2   :  { %197 = vmatpush.msk.msra.mxu1 %vm35_vm0, %v28_v0  ;;  %195 = vmatpush.msk.msra.mxu0 %vm35_vm0, %v27_v2  ;;  %v24_v3 = vld [vmem:[%s319_s2 + $0x48] sm:$0xff]  ;;  %v22_v4 = vld [vmem:[%s319_s2 + $0x38] sm:$0xff]  ;;  %v21_v5 = vld [vmem:[%s319_s2 + $0x30] sm:$0xff] }
   0x3   :  { %v19_v6 = vld [vmem:[%s319_s2 + $0x20] sm:$0xff]  ;;  %v18_v7 = vld [vmem:[%s319_s2 + $0x18] sm:$0xff] }
   0x4   :  { %81 = vmatpush.msra.mxu1 %v25_v1  ;;  %51 = vmatpush.msra.mxu0 %v24_v3 }
   0x5   :  { %8 = vsyncpa [#allocation3], 0  ;;  %v16_v8 = vld [vmem:[%s319_s2 + $0x8] sm:$0xff]  ;;  %v15_v9 = vld [vmem:[%s319_s2] sm:$0xff]  ;;  %vm31_vm1 = vcmask 269312   ;;  %vm129_vm2 = vcmask 64512  }
   0x6   :  { %82 = vmatpush.msra.mxu1 %v22_v4  ;;  %52 = vmatpush.msra.mxu0 %v21_v5  ;;  %v59_v10 = vld [vmem:[%s318_s1] sm:$0xff]  ;;  %v29_v14 = vld [vmem:[%s319_s2 + $0x70] sm:$0x1]  ;;  %v26_v17 = vld [vmem:[%s319_s2 + $0x58] sm:$0xff]  ;;  %s186_s20 = sshll.u32 %s320_s3, 4  ;;  %s187_s20 = int_to_ptr.hbm [resolvable:$true] %s186_s20 }
   0x7   :  { %v30_v11 = vld [vmem:[%s317_s0] sm:$0xff]  ;;  %199 = vmatpush.msk.msra.mxu2 %vm35_vm0, %v29_v14  ;;  %v20_v19 = vld [vmem:[%s319_s2 + $0x28] sm:$0xff]  ;;  %v17_v20 = vld [vmem:[%s319_s2 + $0x10] sm:$0xff] }
   0x8   :  { %83 = vmatpush.msra.mxu1 %v19_v6  ;;  %53 = vmatpush.msra.mxu0 %v18_v7  ;;  %v23_v18 = vld [vmem:[%s319_s2 + $0x40] sm:$0xff]  ;;  %s233_s2 = smov [#allocation2]  }
   0x9   :  { %101 = vmatpush.msra.mxu2 %v26_v17  ;;  %s184_s17 = sshll.u32 %s233_s2, 4  ;;  %s185_s17 = int_to_ptr.vmem [resolvable:$true] %s184_s17 }
   0xa   :  { %84 = vmatpush.msra.mxu1 %v16_v8  ;;  %54 = vmatpush.msra.mxu0 %v15_v9 }
   0xb   :  { %198 = vmatmul.msk.f32.vlgmr.msra.gmra.mxu1 %vm31_vm1, %v59_v10  ;;  %196 = vmatmul.msk.f32.vlgmr.msra.gmra.mxu0 %vm31_vm1, %v30_v11 }
   0xc   :  { %102 = vmatpush.msra.mxu2 %v23_v18 }
   0xe   :  { %103 = vmatpush.msra.mxu2 %v20_v19 }
  0x10   :  { %104 = vmatpush.msra.mxu2 %v17_v20 }
  0x11   :  { %200 = vmatmul.msk.f32.vlgmr.msra.gmra.mxu2 %vm31_vm1, %v59_v10 }
  0x88   :  { %v86_v12 = vpop.f32.mrf.mxu1  ;;  %v56_v13 = vpop.f32.mrf.mxu0 }
  0x89   :  { %124 = vmatpush.xpose.msra.mxu3 %v86_v12 }
  0x8c   :  { %125 = vmatmul.f32.vlgmr.msra.gmra.mxu3 %v56_v13 }
  0x94   :  { %v106_v26 = vpop.f32.mrf.mxu2 }
  0x95   :  { %173 = vmatpush.msrb.mxu3 %v106_v26 }
 0x10f   :  { %v126_v15 = vpop.f32.mrf.mxu3 }
 0x110   :  { %v130_v16 = vsel %vm129_vm2, %v126_v15, -inf }
 0x111   :  { %131 = vmax.xlane.f32.xlu0 %v130_v16 }
 0x184   :  { %v132_v21 = vpop.xlane.xlu0 %131 }
 0x185   :  { %v133_v22 = vsub.f32 %v126_v15, %v132_v21 }
 0x187   :  { %v134_v23 = vmul.f32 1.442695, %v133_v22 }
 0x189   :  { %203 = vpow2.f32 %v134_v23 }
 0x18f   :  { %v204_v24 = vpop.eup %203 }
 0x190   :  { %v136_v25 = vsel %vm129_vm2, %v204_v24, 0.0 }
 0x191   :  { %137 = vadd.xlane.f32.xlu0 %v136_v25 }
 0x204   :  { %v138_v27 = vpop.xlane.xlu0 %137 }
 0x205   :  { %205 = vrcp.f32 %v138_v27  ;;  %v150_v31 = vand.u32 2147483648, %v138_v27  ;;  %v148_v33 = vand.u32 2147483647, %v138_v27  ;;  %vm144_vm4 = vweird.f32 %v138_v27 }
 0x207   :  { %v151_v35 = vor.u32 1.1754944e-38, %v150_v31  ;;  %vm149_vm6 = vcmp.eq.f32.partialorder %v148_v33, 8.507059e+37 }
 0x20b   :  { %v206_v28 = vpop.eup %205 }
 0x20c   :  { %v140_v29 = vmul.f32 %v206_v28, %v138_v27  ;;  %vm145_vm3 = vweird.f32 %v206_v28 }
 0x20d   :  { %vm146_vm5 = vmor %vm144_vm4, %vm145_vm3 }
 0x20e   :  { %v141_v30 = vsub.f32 1.0, %v140_v29 }
 0x210   :  { %v142_v32 = vmul.f32 %v206_v28, %v141_v30 }
 0x212   :  { %v143_v34 = vadd.f32 %v206_v28, %v142_v32 }
 0x214   :  { %v147_v36 = vsel %vm146_vm5, %v206_v28, %v143_v34 }
 0x215   :  { %v152_v37 = vsel %vm149_vm6, %v151_v35, %v147_v36 }
 0x216   :  { %v154_v38 = vmul.f32 %v204_v24, %v152_v37 }
 0x218   :  { %201 = vmatmul.msk.f32.vlgmr.msrb.gmra.mxu3 %vm129_vm2, %v154_v38 }
 0x29b   :  { %v175_v39 = vpop.f32.mrf.mxu3 }
 0x29c   :  { %178 = vst [vmem:[#allocation2] sm:$0xff] %v175_v39 }
 0x29d   :  { %189 = dma.vmem_to_hbm [thread:$0]  %s185_s17, 128, %s187_s20, [#allocation3]  }
 0x29e   :  { %231 = dma.done.wait [#allocation3], 128  }
 0x29f   :  { %232 = vsyncadd [#allocation3], 4294967168 }
 0x2a0   :  { %194 = vsyncpa [#allocation3], 1 }

</bundles_post_ra>
